<compile_context>
chip_gen: v5e
topology: v5e:2x2
jax: 0.10.0
libtpu: 0.0.40
codegen_flags: <defaults>
</compile_context>

<pallas_src>
import functools

import jax
import jax.numpy as jnp
from jax.experimental import pallas as pl
from jax.experimental.pallas import tpu as pltpu

_LANES = 128


def _prenorm_kernel(x_ref, g_ref, b_ref, o_ref, *, eps, fn):
    # x_ref: (C, TR, 128) block; channel axis is the leading (non-layout) dim.
    x = x_ref[...].astype(jnp.float32)                        # (C, TR, 128)
    c = x.shape[0]
    inv_c = 1.0 / c

    # One-pass mean / biased variance over the channel axis (fp32 accumulation).
    s1 = jnp.sum(x, axis=0, keepdims=True)                    # (1, TR, 128)
    s2 = jnp.sum(x * x, axis=0, keepdims=True)                # (1, TR, 128)
    mean = s1 * inv_c
    var = jnp.maximum(s2 * inv_c - mean * mean, 0.0)          # unbiased=False
    inv = jax.lax.rsqrt(var + eps)                            # (1, TR, 128)

    g = g_ref[...].astype(jnp.float32)                        # (C, 1, 1)
    b = b_ref[...].astype(jnp.float32)                        # (C, 1, 1)

    y = (x - mean) * (inv * g) + b                            # LayerNorm(dim=1)
    y = fn(y)                                                 # PreNorm: fn(norm(x))
    o_ref[...] = y.astype(o_ref.dtype)


def prenorm(x, g, b, *, eps=1e-5, fn=lambda y: y,
            target_block_bytes=4 * 1024 * 1024):
    """PreNorm forward: fn(LayerNorm_channel(x)).

    x: (N, C, D, H, W)   g, b: (1, C, 1, 1, 1)
    fn must be an elementwise jnp-traceable function (fused after the norm).
    """
    # TODO(synk): a wrapped `fn` with its own parameters (attention / conv
    # blocks) needs its own kernel; only elementwise fn is fused here.
    N, C, D, H, W = x.shape
    S = D * H * W
    itemsize = jnp.dtype(x.dtype).itemsize

    rows = pl.cdiv(S, _LANES)

    # Rows per tile: keep one (C, TR, 128) block around target_block_bytes so
    # double-buffered in+out fits comfortably in scoped VMEM on v5e/v6e/v7x.
    per_row_bytes = C * _LANES * itemsize
    tr = max(8, (target_block_bytes // per_row_bytes) // 8 * 8)
    if tr >= rows:
        tr = rows                       # full extent along rows is allowed
        rows_pad = rows
    else:
        rows_pad = pl.cdiv(rows, tr) * tr
    s_pad = rows_pad * _LANES

    x_r = x.reshape(N, C, S)
    if s_pad != S:
        # Padded lanes only affect their own (discarded) outputs: the
        # reduction is over C, never over the padded spatial positions.
        x_r = jnp.pad(x_r, ((0, 0), (0, 0), (0, s_pad - S)))
    x_r = x_r.reshape(N, C, rows_pad, _LANES)
    g_r = g.reshape(C, 1, 1)
    b_r = b.reshape(C, 1, 1)

    kernel = functools.partial(_prenorm_kernel, eps=eps, fn=fn)
    num_row_tiles = rows_pad // tr

    out = pl.pallas_call(
        kernel,
        out_shape=jax.ShapeDtypeStruct((N, C, rows_pad, _LANES), x.dtype),
        grid=(N, num_row_tiles),
        in_specs=[
            pl.BlockSpec((None, C, tr, _LANES), lambda n, r: (n, 0, r, 0)),
            pl.BlockSpec((C, 1, 1), lambda n, r: (0, 0, 0)),   # g (resident)
            pl.BlockSpec((C, 1, 1), lambda n, r: (0, 0, 0)),   # b (resident)
        ],
        out_specs=pl.BlockSpec((None, C, tr, _LANES), lambda n, r: (n, 0, r, 0)),
        compiler_params=pltpu.CompilerParams(
            dimension_semantics=("parallel", "parallel"),
        ),
    )(x_r, g_r, b_r)

    out = out.reshape(N, C, s_pad)[:, :, :S]
    return out.reshape(N, C, D, H, W)


def _reference(x, g, b, *, eps=1e-5, fn=lambda y: y):
    xf = x.astype(jnp.float32)
    mean = jnp.mean(xf, axis=1, keepdims=True)
    var = jnp.mean((xf - mean) ** 2, axis=1, keepdims=True)
    y = (xf - mean) / jnp.sqrt(var + eps) * g + b
    return fn(y).astype(x.dtype)


if __name__ == "__main__":
    key = jax.random.PRNGKey(0)
    k0, k1 = jax.random.split(key)

    # --- main check: small (N, C, D, H, W) shape, GELU fused as PreNorm.fn ---
    N, C, D, H, W = 2, 4, 4, 8, 8
    x = jax.random.normal(k0, (N, C, D, H, W), dtype=jnp.float32)
    # LayerNorm.__init__: g = ones(1, dim, 1, 1, 1), b = zeros(1, dim, 1, 1, 1)
    g = jnp.ones((1, C, 1, 1, 1), dtype=jnp.float32)
    b = jnp.zeros((1, C, 1, 1, 1), dtype=jnp.float32)
    fn = jax.nn.gelu

    out = prenorm(x, g, b, eps=1e-5, fn=fn)
    out = jax.block_until_ready(out)
    ref = _reference(x, g, b, eps=1e-5, fn=fn)
    assert out.shape == (N, C, D, H, W)
    assert jnp.allclose(out, ref, atol=1e-4, rtol=1e-4), (
        float(jnp.max(jnp.abs(out - ref)))
    )

    # --- second check: ragged S (needs padding) + forced multi-tile grid ----
    N2, C2, D2, H2, W2 = 1, 4, 8, 15, 20          # S = 2400 -> 19 rows -> pad
    x2 = jax.random.normal(k1, (N2, C2, D2, H2, W2), dtype=jnp.float32)
    g2 = jnp.ones((1, C2, 1, 1, 1), dtype=jnp.float32)
    b2 = jnp.zeros((1, C2, 1, 1, 1), dtype=jnp.float32)
    out2 = prenorm(x2, g2, b2, eps=1e-5,
                   target_block_bytes=C2 * 8 * _LANES * 4)    # TR=8 -> 3 tiles
    out2 = jax.block_until_ready(out2)
    ref2 = _reference(x2, g2, b2, eps=1e-5)
    assert out2.shape == (N2, C2, D2, H2, W2)
    assert jnp.allclose(out2, ref2, atol=1e-4, rtol=1e-4), (
        float(jnp.max(jnp.abs(out2 - ref2)))
    )

    print("KERNEL_OK")
</pallas_src>

<mosaic_0001>
module attributes {stable_mosaic.version = 11 : i64} {
  func.func @_prenorm_kernel(%arg0: i32, %arg1: i32, %arg2: memref<1x4x2x128xf32, #tpu.memory_space<vmem>>, %arg3: memref<4x1x1xf32, #tpu.memory_space<vmem>>, %arg4: memref<4x1x1xf32, #tpu.memory_space<vmem>>, %arg5: memref<1x4x2x128xf32, #tpu.memory_space<vmem>>) attributes {dimension_semantics = [#tpu.dimension_semantics<parallel>, #tpu.dimension_semantics<parallel>], iteration_bounds = array<i64: 2, 1>, scalar_prefetch = 0 : i64, scratch_operands = 0 : i64, tpu.core_type = #tpu.core_type<tc>, window_params = [{transform_indices = @transform_0, window_bounds = array<i64: 1, 4, 2, 128>}, {pipeline_mode = #tpu.pipeline_mode<synchronous>, transform_indices = @transform_1, window_bounds = array<i64: 4, 1, 1>}, {pipeline_mode = #tpu.pipeline_mode<synchronous>, transform_indices = @transform_2, window_bounds = array<i64: 4, 1, 1>}, {transform_indices = @transform_3, window_bounds = array<i64: 1, 4, 2, 128>}]} {
    %c0 = arith.constant 0 : index
    %c0_0 = arith.constant 0 : index
    %c0_1 = arith.constant 0 : index
    %c0_2 = arith.constant 0 : index
    %0 = vector.load %arg2[%c0, %c0_0, %c0_1, %c0_2] : memref<1x4x2x128xf32, #tpu.memory_space<vmem>>, vector<1x4x2x128xf32>
    %1 = vector.shape_cast %0 : vector<1x4x2x128xf32> to vector<4x2x128xf32>
    %cst = arith.constant dense<0.000000e+00> : vector<2x128xf32>
    %2 = vector.multi_reduction <add>, %1, %cst [0] : vector<4x2x128xf32> to vector<2x128xf32>
    %3 = vector.shape_cast %2 : vector<2x128xf32> to vector<1x2x128xf32>
    %4 = arith.mulf %1, %1 : vector<4x2x128xf32>
    %cst_3 = arith.constant dense<0.000000e+00> : vector<2x128xf32>
    %5 = vector.multi_reduction <add>, %4, %cst_3 [0] : vector<4x2x128xf32> to vector<2x128xf32>
    %6 = vector.shape_cast %5 : vector<2x128xf32> to vector<1x2x128xf32>
    %cst_4 = arith.constant 2.500000e-01 : f32
    %7 = vector.broadcast %cst_4 : f32 to vector<1x2x128xf32>
    %8 = arith.mulf %3, %7 : vector<1x2x128xf32>
    %cst_5 = arith.constant 2.500000e-01 : f32
    %9 = vector.broadcast %cst_5 : f32 to vector<1x2x128xf32>
    %10 = arith.mulf %6, %9 : vector<1x2x128xf32>
    %11 = arith.mulf %8, %8 : vector<1x2x128xf32>
    %12 = arith.subf %10, %11 : vector<1x2x128xf32>
    %cst_6 = arith.constant 0.000000e+00 : f32
    %13 = vector.broadcast %cst_6 : f32 to vector<1x2x128xf32>
    %14 = arith.maximumf %12, %13 : vector<1x2x128xf32>
    %cst_7 = arith.constant 9.99999974E-6 : f32
    %15 = vector.broadcast %cst_7 : f32 to vector<1x2x128xf32>
    %16 = arith.addf %14, %15 : vector<1x2x128xf32>
    %17 = math.rsqrt %16 : vector<1x2x128xf32>
    %c0_8 = arith.constant 0 : index
    %c0_9 = arith.constant 0 : index
    %c0_10 = arith.constant 0 : index
    %18 = vector.load %arg3[%c0_8, %c0_9, %c0_10] : memref<4x1x1xf32, #tpu.memory_space<vmem>>, vector<4x1x1xf32>
    %c0_11 = arith.constant 0 : index
    %c0_12 = arith.constant 0 : index
    %c0_13 = arith.constant 0 : index
    %19 = vector.load %arg4[%c0_11, %c0_12, %c0_13] : memref<4x1x1xf32, #tpu.memory_space<vmem>>, vector<4x1x1xf32>
    %20 = vector.broadcast %8 : vector<1x2x128xf32> to vector<4x2x128xf32>
    %21 = arith.subf %1, %20 : vector<4x2x128xf32>
    %22 = vector.broadcast %17 : vector<1x2x128xf32> to vector<4x2x128xf32>
    %23 = vector.broadcast %18 : vector<4x1x1xf32> to vector<4x2x128xf32>
    %24 = arith.mulf %22, %23 : vector<4x2x128xf32>
    %25 = arith.mulf %21, %24 : vector<4x2x128xf32>
    %26 = vector.broadcast %19 : vector<4x1x1xf32> to vector<4x2x128xf32>
    %27 = arith.addf %25, %26 : vector<4x2x128xf32>
    %28 = arith.mulf %27, %27 : vector<4x2x128xf32>
    %29 = arith.mulf %27, %28 : vector<4x2x128xf32>
    %cst_14 = arith.constant 4.471500e-02 : f32
    %30 = vector.broadcast %cst_14 : f32 to vector<4x2x128xf32>
    %31 = arith.mulf %30, %29 : vector<4x2x128xf32>
    %32 = arith.addf %27, %31 : vector<4x2x128xf32>
    %cst_15 = arith.constant 0.797884583 : f32
    %33 = vector.broadcast %cst_15 : f32 to vector<4x2x128xf32>
    %34 = arith.mulf %33, %32 : vector<4x2x128xf32>
    %35 = math.tanh %34 : vector<4x2x128xf32>
    %cst_16 = arith.constant 1.000000e+00 : f32
    %36 = vector.broadcast %cst_16 : f32 to vector<4x2x128xf32>
    %37 = arith.addf %36, %35 : vector<4x2x128xf32>
    %cst_17 = arith.constant 5.000000e-01 : f32
    %38 = vector.broadcast %cst_17 : f32 to vector<4x2x128xf32>
    %39 = arith.mulf %38, %37 : vector<4x2x128xf32>
    %40 = arith.mulf %27, %39 : vector<4x2x128xf32>
    %c0_18 = arith.constant 0 : index
    %c0_19 = arith.constant 0 : index
    %c0_20 = arith.constant 0 : index
    %c0_21 = arith.constant 0 : index
    %41 = vector.load %arg5[%c0_18, %c0_19, %c0_20, %c0_21] : memref<1x4x2x128xf32, #tpu.memory_space<vmem>>, vector<1x4x2x128xf32>
    %42 = vector.shape_cast %41 : vector<1x4x2x128xf32> to vector<4x2x128xf32>
    %43 = vector.shape_cast %40 : vector<4x2x128xf32> to vector<1x4x2x128xf32>
    tpu.vector_store %arg5[%c0_18, %c0_19, %c0_20, %c0_21], %43 {strides = array<i32>} : memref<1x4x2x128xf32, #tpu.memory_space<vmem>>, vector<1x4x2x128xf32>,
    return
  }
  func.func @transform_0(%arg0: i32, %arg1: i32) -> (i32, i32, i32, i32) {
    %c0_i32 = arith.constant 0 : i32
    %c0_i32_0 = arith.constant 0 : i32
    %c0_i32_1 = arith.constant 0 : i32
    return %arg0, %c0_i32, %arg1, %c0_i32_0 : i32, i32, i32, i32
  }
  func.func @transform_1(%arg0: i32, %arg1: i32) -> (i32, i32, i32) {
    %c0_i32 = arith.constant 0 : i32
    %c0_i32_0 = arith.constant 0 : i32
    %c0_i32_1 = arith.constant 0 : i32
    %c0_i32_2 = arith.constant 0 : i32
    return %c0_i32, %c0_i32_0, %c0_i32_1 : i32, i32, i32
  }
  func.func @transform_2(%arg0: i32, %arg1: i32) -> (i32, i32, i32) {
    %c0_i32 = arith.constant 0 : i32
    %c0_i32_0 = arith.constant 0 : i32
    %c0_i32_1 = arith.constant 0 : i32
    %c0_i32_2 = arith.constant 0 : i32
    return %c0_i32, %c0_i32_0, %c0_i32_1 : i32, i32, i32
  }
  func.func @transform_3(%arg0: i32, %arg1: i32) -> (i32, i32, i32, i32) {
    %c0_i32 = arith.constant 0 : i32
    %c0_i32_0 = arith.constant 0 : i32
    %c0_i32_1 = arith.constant 0 : i32
    return %arg0, %c0_i32, %arg1, %c0_i32_0 : i32, i32, i32, i32
  }
}

</mosaic_0001>

<bundles_post_ra>
// kernel: tpu_custom_call.1
= control target key start
LH: loop header
LB: loop body
LE: loop exit
PB: predicated region body
PF: predicated region fallthrough
CT: control target
= control target key end

     0   :  { %8 = vsyncpa [#allocation3], 0  ;;  %s867_s0 = inlined_call_operand.hbm [shape: f32[2,4,2,128], index: 0, kind: input, shape index: {}]   ;;  %s868_s1 = inlined_call_operand.vmem [shape: f32[4,1,1], index: 1, kind: input, shape index: {}]   ;;  %s869_s2 = inlined_call_operand.vmem [shape: f32[4,1,1], index: 2, kind: input, shape index: {}]   ;;  %s870_s3 = inlined_call_operand.hbm [shape: f32[2,4,2,128], index: 3, kind: output, shape index: {}]  }
   0x1   :  { %10 = vsyncpa [#allocation3 + $0x1], 0 }
   0x2   :  { %11 = vsyncpa [#allocation4], 0 }
   0x3   :  { %13 = vsyncpa [#allocation4 + $0x1], 0  ;;  %s705_s12 = smov 0   ;;  %s707_s13 = smov 0  }
   0x4   :  { %s709_s14 = smov 0   ;;  %s711_s15 = smov 0  }
   0x5   :  { %s713_s16 = smov 0   ;;  %s715_s17 = smov 0  }
   0x6 LB: > { %s461_s18 = sadd.s32 4294967295, %s678_s17   ;;  %s462_s19 = sadd.s32 4294967294, %s678_s17   ;;  %s678_s17 = sphi %s715_s17, %s19_s17   ;;  %s674_s16 = sphi %s713_s16, %s879_s16   ;;  %s670_s15 = sphi %s711_s15, %s878_s15   ;;  %s666_s14 = sphi %s709_s14, %s877_s14   ;;  %s662_s13 = sphi %s707_s13, %s876_s13   ;;  %s658_s12 = sphi %s705_s12, %s875_s12  }
   0x7   : > { %s31_s20 = sadd.s32 1, %s674_s16  ;;  %s40_s21 = sadd.s32 1, %s666_s14 }
   0x8   : > { %p33_p0 = scmp.ge.s32.totalorder %s31_s20, 2  ;;  %p47_p1 = scmp.ne.s32.totalorder %s666_s14, %s662_s13 }
   0x9   : > { %p48_p2 = scmp.eq.s32.totalorder %s678_s17, 0  ;;  %p53_p3 = scmp.ne.s32.totalorder %s662_s13, %s658_s12 }
   0xa   : > { %s881_s20 = smov (%p33_p0, %s31_s20), 0  ;;  %p54_p5 = scmp.eq.s32.totalorder %s461_s18, 0 }
   0xb   : > { %p746_p4 = por %p48_p2, %p47_p1  ;;  %s35_s23 = ssub.s32 %s674_s16, %s881_s20 }
   0xc   : > { %p121_p6 = scmp.eq.s32.totalorder %s461_s18, 1  ;;  %p38_p7 = scmp.eq.s32.totalorder %s35_s23, 0 }
   0xd   : > { %p752_p8 = por %p54_p5, %p53_p3  ;;  %p127_p10 = scmp.eq.s32.totalorder %s462_s19, 1 }
   0xe   : > { %p756_p9 = por %p121_p6, %p47_p1  ;;  %p464_p12 = scmp.ge.s32.totalorder %s678_s17, 2 }
   0xf   : > { %s761_s26 = scalar_select %p38_p7, %s666_s14, %s40_s21  }
  0x10   : > { %p763_p11 = por %p127_p10, %p53_p3  ;;  %p490_p13 = scmp.lt.s32.totalorder %s678_s17, 2 }
  0x11   : > { %s153_s28 = sand.u32 1, %s666_s14   ;;  %s476_s30 = sshll.u32 %s674_s16, 3 }
  0x12   : > { %s465_s29 = sshll.u32 %s153_s28, 3  ;;  %s163_s6 = scalar_lea.hbm %s867_s0, %s476_s30 }
  0x13   : > { %s157_s7 = scalar_lea.vmem [#allocation2], %s465_s29  ;;  %s164_s9 = sshll.u32 %s163_s6, 4  ;;  %s165_s9 = int_to_ptr.hbm [resolvable:$true] %s164_s9 }
  0x14   : > { %s166_s8 = sshll.u32 %s157_s7, 4  ;;  %p483_p0 = pnand %p490_p13, %p746_p4  ;;  %s167_s8 = int_to_ptr.vmem [resolvable:$true] %s166_s8 }
  0x15   : > { %p468_p1 = scmp.ge.s32.totalorder %s678_s17, 1  ;;  %s154_s10 = scalar_lea.sflag [#allocation3], %s153_s28 }
  0x16   : > { %s680_s11 = smov 32   ;;  %s681_s18 = smov 2  }
  0x17   : > { %485 = dma.hbm_to_vmem [thread:$0]  (!%p483_p0), %s165_s9, 128, %s167_s8, %s154_s10, %s680_s11, %s680_s11, %s681_s18  }
  0x18   : > { %p174_p2 = scmp.lt.s32.totalorder %s678_s17, 3 }
  0x1a   : > { %p175_p3 = pnand %p468_p1, %p174_p2 }
  0x1b   : > { %s779_s19 = sand.u32 (!%p175_p3), 1, %s662_s13  }
  0x1c   : > { %178 = sbr.rel (%p175_p3) target bundleno = 197 (0xc5), region = 32  ;;  %s469_s21 = sshll.u32 (!%p175_p3), %s779_s19, 3 }
  0x1d   : > { %s181_s23 = scalar_lea.sflag (!%p175_p3), [#allocation3], %s779_s19  ;;  %s785_s22 = scalar_lea.vmem (!%p175_p3), [#allocation2], %s469_s21 }
  0x21   : > { %649 = dma.done.wait (%p752_p8), %s181_s23, 128  }
  0x22   : > { %651 = vsyncadd (%p752_p8), %s181_s23, 4294967168  ;;  %v682_v0 = vmov 0   ;;  %v548_v1 = vld [vmem:[%s868_s1 + $0x2] ss:$0 sm:$0xff]  ;;  %v549_v2 = vld [vmem:[%s868_s1] ss:$0 sm:$0xff] }
  0x23   : > { %546 = vset.pattern.permute.xlu1 %v682_v0  ;;  %545 = vset.pattern.permute.xlu0 %v682_v0  ;;  %v554_v3 = vld [vmem:[%s869_s2] ss:$0 sm:$0xff]  ;;  %v550_v4 = vld [vmem:[%s868_s1 + $0x3] ss:$0 sm:$0xff]  ;;  %v551_v5 = vld [vmem:[%s868_s1 + $0x1] ss:$0 sm:$0xff] }
  0x24   : > { %547 = vset.pattern.permute.xlu2 %v682_v0  ;;  %276 = vperm.xlu1 %546, %v548_v1   ;;  %v555_v6 = vld [vmem:[%s869_s2 + $0x1] ss:$0 sm:$0xff]  ;;  %v552_v7 = vld [vmem:[%s869_s2 + $0x3] ss:$0 sm:$0xff]  ;;  %v553_v8 = vld [vmem:[%s869_s2 + $0x2] ss:$0 sm:$0xff] }
  0x25   : > { %268 = vperm.xlu0 %545, %v549_v2   ;;  %300 = vperm.xlu2 %547, %v554_v3   ;;  %vm212_vm0 = vcmask 1041408   ;;  %v208_v9 = vld [vmem:[%s785_s22] sm:$0x3]  ;;  %v209_v10 = vld [vmem:[%s785_s22 + $0x2] sm:$0x3]  ;;  %s477_s30 = sshll.u32 %s670_s15, 3 }
  0x26   : > { %v213_v11 = vsel %vm212_vm0, %v208_v9, 0.0  ;;  %v214_v12 = vsel %vm212_vm0, %v209_v10, 0.0  ;;  %v220_v13 = vmul.f32 %v208_v9, %v208_v9  ;;  %v221_v14 = vmul.f32 %v209_v10, %v209_v10  ;;  %v210_v15 = vld [vmem:[%s785_s22 + $0x4] sm:$0x3]  ;;  %v211_v21 = vld [vmem:[%s785_s22 + $0x6] sm:$0x3]  ;;  %s372_s6 = scalar_lea.hbm %s870_s3, %s477_s30 }
  0x27   : > { %v215_v16 = vadd.f32 %v214_v12, %v213_v11  ;;  %v216_v17 = vsel %vm212_vm0, %v210_v15, 0.0  ;;  %v222_v18 = vmul.f32 %v210_v15, %v210_v15  ;;  %v218_v24 = vsel %vm212_vm0, %v211_v21, 0.0  ;;  %s207_s22 = scalar_lea.vmem [#allocation5], %s469_s21  ;;  %s375_s7 = sshll.u32 %s372_s6, 4  ;;  %s376_s7 = int_to_ptr.hbm [resolvable:$true] %s375_s7 }
  0x28   : > { %v224_v19 = vsel %vm212_vm0, %v220_v13, 0.0  ;;  %v225_v20 = vsel %vm212_vm0, %v221_v14, 0.0  ;;  %v223_v25 = vmul.f32 %v211_v21, %v211_v21  ;;  %s373_s24 = sshll.u32 %s207_s22, 4  ;;  %s360_s15 = scalar_lea.sflag [#allocation4], %s779_s19  ;;  %s374_s24 = int_to_ptr.vmem [resolvable:$true] %s373_s24 }
  0x29   : > { %v217_v22 = vadd.f32 %v216_v17, %v215_v16  ;;  %v226_v23 = vadd.f32 %v225_v20, %v224_v19  ;;  %v227_v26 = vsel %vm212_vm0, %v222_v18, 0.0  ;;  %s610_s21 = sshra.s32 %s376_s7, 4  ;;  %s616_s11 = scalar_lea.hbm %s870_s3, 16  ;;  %s611_s21 = int_to_ptr.hbm [resolvable:$true] %s610_s21 }
  0x2a   : > { %v229_v29 = vsel %vm212_vm0, %v223_v25, 0.0  ;;  %s612_s8 = scalar_lea.hbm %s611_s21, 8  ;;  %p617_p7 = scmp.lt.s32.totalorder %s611_s21, %s870_s3 }
  0x2b   : > { %v219_v27 = vadd.f32 %v218_v24, %v217_v22  ;;  %v228_v28 = vadd.f32 %v227_v26, %v226_v23  ;;  %p613_p4 = scmp.ne.s32.totalorder %s611_s21, %s612_s8  ;;  %p618_p8 = scmp.lt.s32.totalorder %s616_s11, %s612_s8 }
  0x2c   : > { %280 = vperm.xlu1 %546, %v550_v4  }
  0x2d   : > { %272 = vperm.xlu0 %545, %v551_v5   ;;  %304 = vperm.xlu2 %547, %v555_v6   ;;  %v230_v30 = vadd.f32 %v229_v29, %v228_v28  ;;  %v231_v31 = vmul.f32 0.25, %v219_v27  ;;  %p614_p5 = pnand %p613_p4, %p756_p9  ;;  %p619_p10 = por %p618_p8, %p617_p7 }
  0x2f   : > { %v232_v32 = vmul.f32 0.25, %v230_v30  ;;  %v233_v33 = vmul.f32 %v231_v31, %v231_v31  ;;  %v255_v45 = vsub.f32 %v208_v9, %v231_v31  ;;  %v256_v53 = vsub.f32 %v209_v10, %v231_v31  ;;  %p615_p6 = pneg %p614_p5 }
  0x30   : > { %v258_v58 = vsub.f32 %v211_v21, %v231_v31  ;;  %v257_v62 = vsub.f32 %v210_v15, %v231_v31 }
  0x31   : > { %v234_v34 = vsub.f32 %v232_v32, %v233_v33  ;;  %p620_p13 = pnand %p619_p10, %p615_p6 }
  0x33   : > { %v235_v35 = vmax.f32 %v234_v34, 0.0 }
  0x34   : > { %312 = vperm.xlu1 %546, %v552_v7  }
  0x35   : > { %308 = vperm.xlu0 %545, %v553_v8   ;;  %v236_v36 = vadd.f32 1e-05, %v235_v35 }
  0x37   : > { %556 = vrsqrt.f32 %v236_v36  ;;  %vm243_vm1 = vweird.f32 %v236_v36 }
  0x3d   : > { %v557_v37 = vpop.eup %556 }
  0x3e   : > { %v238_v38 = vmul.f32 %v557_v37, %v236_v36  ;;  %vm244_vm2 = vweird.f32 %v557_v37 }
  0x3f   : > { %vm245_vm3 = vmor %vm243_vm1, %vm244_vm2 }
  0x40   : > { %v239_v39 = vmul.f32 %v557_v37, %v238_v38 }
  0x42   : > { %v240_v40 = vmul.f32 0.5, %v239_v39 }
  0x44   : > { %v241_v41 = vsub.f32 1.5, %v240_v40 }
  0x46   : > { %v242_v42 = vmul.f32 %v557_v37, %v241_v41 }
  0x48   : > { %v246_v43 = vsel %vm245_vm3, %v557_v37, %v242_v42 }
  0x7f   : > { %v301_v48 = vpop.permute.xlu2 %300 }
  0x87   : > { %v305_v63 = vpop.permute.xlu2 %304 }
  0x96   : > { %v277_v44 = vpop.permute.xlu1 %276 }
  0x97   : > { %v269_v46 = vpop.permute.xlu0 %268  ;;  %v285_v59 = vmul.f32 %v277_v44, %v246_v43 }
  0x98   : > { %v283_v47 = vmul.f32 %v269_v46, %v246_v43 }
  0x99   : > { %v289_v6 = vmul.f32 %v285_v59, %v257_v62 }
  0x9a   : > { %v287_v49 = vmul.f32 %v283_v47, %v255_v45 }
  0x9c   : > { %v315_v50 = vadd.f32 %v301_v48, %v287_v49 }
  0x9e   : > { %v319_v51 = vmul.f32 %v315_v50, %v315_v50  ;;  %v281_v52 = vpop.permute.xlu1 %280 }
  0x9f   : > { %v273_v54 = vpop.permute.xlu0 %272  ;;  %v286_v57 = vmul.f32 %v281_v52, %v246_v43 }
  0xa0   : > { %v323_v55 = vmul.f32 %v319_v51, %v315_v50  ;;  %v284_v56 = vmul.f32 %v273_v54, %v246_v43 }
  0xa1   : > { %v290_v2 = vmul.f32 %v286_v57, %v258_v58 }
  0xa2   : > { %v327_v60 = vmul.f32 0.044715, %v323_v55  ;;  %v288_v61 = vmul.f32 %v284_v56, %v256_v53 }
  0xa4   : > { %v331_v0 = vadd.f32 %v327_v60, %v315_v50  ;;  %v316_v1 = vadd.f32 %v305_v63, %v288_v61 }
  0xa6   : > { %v335_v3 = vmul.f32 0.7978846, %v331_v0  ;;  %v320_v4 = vmul.f32 %v316_v1, %v316_v1  ;;  %v313_v5 = vpop.permute.xlu1 %312 }
  0xa7   : > { %v318_v7 = vadd.f32 %v313_v5, %v290_v2  ;;  %v309_v8 = vpop.permute.xlu0 %308 }
  0xa8   : > { %558 = vtanh.f32 %v335_v3  ;;  %v324_v9 = vmul.f32 %v320_v4, %v316_v1  ;;  %v317_v10 = vadd.f32 %v309_v8, %v289_v6 }
  0xa9   : > { %v322_v11 = vmul.f32 %v318_v7, %v318_v7 }
  0xaa   : > { %v328_v12 = vmul.f32 0.044715, %v324_v9  ;;  %v321_v13 = vmul.f32 %v317_v10, %v317_v10 }
  0xab   : > { %v326_v14 = vmul.f32 %v322_v11, %v318_v7 }
  0xac   : > { %v332_v16 = vadd.f32 %v328_v12, %v316_v1  ;;  %v325_v15 = vmul.f32 %v321_v13, %v317_v10 }
  0xad   : > { %v330_v17 = vmul.f32 0.044715, %v326_v14 }
  0xae   : > { %v559_v18 = vpop.eup %558  ;;  %v336_v19 = vmul.f32 0.7978846, %v332_v16  ;;  %v329_v20 = vmul.f32 0.044715, %v325_v15 }
  0xaf   : > { %v343_v21 = vadd.f32 1.0, %v559_v18  ;;  %v334_v22 = vadd.f32 %v330_v17, %v318_v7 }
  0xb0   : > { %560 = vtanh.f32 %v336_v19  ;;  %v333_v23 = vadd.f32 %v329_v20, %v317_v10 }
  0xb1   : > { %v347_v24 = vmul.f32 0.5, %v343_v21  ;;  %v338_v25 = vmul.f32 0.7978846, %v334_v22 }
  0xb2   : > { %v337_v26 = vmul.f32 0.7978846, %v333_v23 }
  0xb3   : > { %v351_v27 = vmul.f32 %v347_v24, %v315_v50  ;;  %562 = vtanh.f32 %v338_v25 }
  0xb4   : > { %564 = vtanh.f32 %v337_v26 }
  0xb5   : > { %355 = vst [vmem:[%s207_s22] sm:$0x3] %v351_v27 }
  0xb6   : > { %v561_v28 = vpop.eup %560 }
  0xb7   : > { %v344_v29 = vadd.f32 1.0, %v561_v28 }
  0xb9   : > { %v563_v30 = vpop.eup %562  ;;  %v348_v31 = vmul.f32 0.5, %v344_v29 }
  0xba   : > { %v565_v32 = vpop.eup %564  ;;  %v346_v33 = vadd.f32 1.0, %v563_v30 }
  0xbb   : > { %v352_v34 = vmul.f32 %v348_v31, %v316_v1  ;;  %v345_v35 = vadd.f32 1.0, %v565_v32 }
  0xbc   : > { %v350_v36 = vmul.f32 0.5, %v346_v33 }
  0xbd   : > { %356 = vst [vmem:[%s207_s22 + $0x2] sm:$0x3] %v352_v34  ;;  %v349_v37 = vmul.f32 0.5, %v345_v35 }
  0xbe   : > { %v354_v38 = vmul.f32 %v350_v36, %v318_v7 }
  0xbf   : > { %v353_v39 = vmul.f32 %v349_v37, %v317_v10 }
  0xc0   : > { %358 = vst [vmem:[%s207_s22 + $0x6] sm:$0x3] %v354_v38 }
  0xc1   : > { %357 = vst [vmem:[%s207_s22 + $0x4] sm:$0x3] %v353_v39 }
  0xc2   : > { %623 = shalt.err (!%p620_p13)
}
  0xc3   : > { %s683_s19 = smov 32   ;;  %s684_s28 = smov 2  }
  0xc4   : > { %480 = dma.vmem_to_hbm [thread:$0]  (%p756_p9), %s374_s24, 128, %s376_s7, %s360_s15, %s683_s19, %s683_s19, %s684_s28  }
  0xc5 PF: > { %s390_s29 = sand.u32 1, %s658_s12   ;;  %p487_p0 = pnand %p464_p12, %p763_p11 }
  0xc6   : > { %s391_s22 = scalar_lea.sflag [#allocation4], %s390_s29 }
  0xc7   : > { %p488_p1 = pneg %p487_p0 }
  0xc9   : > { %653 = dma.done.wait (%p488_p1), %s391_s22, 128  }
  0xca   : > { %655 = vsyncadd (%p488_p1), %s391_s22, 4294967168  ;;  %s19_s17 = sadd.s32 1, %s678_s17   ;;  %s875_s12 = smov %s662_s13 }
  0xcb   : > { %p16_p2 = scmp.ge.s32.totalorder %s19_s17, 4   ;;  %s876_s13 = smov %s666_s14 }
  0xcc   : > { %s877_s14 = smov %s761_s26  ;;  %s878_s15 = smov %s674_s16 }
  0xcd   : > { %s879_s16 = smov %s881_s20  ;;  %18 = sbr.rel (!%p16_p2) target bundleno = 6 (0x6), region = 77 }
  0xd2   :  { %397 = vsyncpa [#allocation3], 1 }
  0xd3   :  { %399 = vsyncpa [#allocation3 + $0x1], 1 }
  0xd4   :  { %400 = vsyncpa [#allocation4], 1 }
  0xd5   :  { %402 = vsyncpa [#allocation4 + $0x1], 1 }

</bundles_post_ra>
